<compile_context>
chip_gen: v6e
topology: v6e:2x2x1
jax: 0.10.0
libtpu: 0.0.40
codegen_flags: <defaults>
</compile_context>

<pallas_src>
import jax
import jax.numpy as jnp
from jax.experimental import pallas as pl
from jax.experimental.pallas import tpu as pltpu

EMBED = 128
COORD_PAD = 8      # pad the 2-d coordinate feature to 8 lanes (zero columns)
K_TILE = 8192      # ~2 MiB bf16 weight per step; 2 bufs x (w + x) ~= 4.5 MiB VMEM
SUBLANE = 8
VMEM_LIMIT = 32 * 1024 * 1024   # explicit; safe on v5e/v6e/v7x


def _round_up(x, m):
    return (x + m - 1) // m * m


def _cdiv(a, b):
    return -(-a // b)


def _k_tiling(d_in, k_tile=K_TILE):
    """Derive (d_pad, tk, nk, num_cores) for the K reduction.

    d_pad is only rounded to 128 (plus what an even core split needs), never
    blindly to a multiple of k_tile, so large tiles don't stream zero weight.
    """
    d128 = _round_up(d_in, 128)
    nk = _cdiv(d128, k_tile)
    # v7x: shard the reduction across both TensorCores when there is anything
    # to shard; on 1-TC chips the extra parallel axis just iterates.
    num_cores = 2 if nk >= 2 else 1
    nk = _round_up(nk, num_cores)
    tk = _round_up(_cdiv(d128, nk), 128)
    nk = _round_up(_cdiv(d128, tk), num_cores)
    d_pad = nk * tk
    return d_pad, tk, nk, num_cores


# ------------------------------ fused kernels ------------------------------ #
def _fused_coords_kernel(x_ref, wi_ref,
                         c_ref, w1_ref, b1_ref, w2_ref, b2_ref, pool_ref,
                         img_ref, coord_ref):
    """grid = (num_cores, nk_per_core).  Each core accumulates its partial
    image matmul directly into its resident output block; the coordinate
    path runs once per core at its first K step (tiny, hidden under DMA)."""
    k = pl.program_id(1)

    @pl.when(k == 0)
    def _():
        img_ref[...] = jnp.zeros_like(img_ref)
        # Coordinate encoder: per-point Linear+ReLU, MXU mean-pool via the
        # pooling matrix (no reshape, no XLU reduction), then projection.
        h = jnp.dot(c_ref[...], w1_ref[...], preferred_element_type=jnp.float32)
        h = jnp.maximum(h + b1_ref[...], 0.0)                         # (BN_pad, 128)
        pooled = jnp.dot(pool_ref[...], h,
                         preferred_element_type=jnp.float32)          # (B_pad, 128)
        coord_ref[...] = (jnp.dot(pooled, w2_ref[...],
                                  preferred_element_type=jnp.float32)
                          + b2_ref[...])

    # Image encoder: stream bf16 weight tiles, cast activations in-kernel,
    # accumulate in f32 directly in the (resident) partial-output block.
    x = x_ref[...].astype(jnp.bfloat16)
    img_ref[...] += jnp.dot(x, wi_ref[...], preferred_element_type=jnp.float32)


def _fused_nopoints_kernel(x_ref, wi_ref, np_ref, img_ref, coord_ref):
    """Image encoder (K-tiled, core-split) fused with the no_points broadcast."""
    k = pl.program_id(1)

    @pl.when(k == 0)
    def _():
        img_ref[...] = jnp.zeros_like(img_ref)
        coord_ref[...] = jnp.broadcast_to(np_ref[...], coord_ref.shape)

    x = x_ref[...].astype(jnp.bfloat16)
    img_ref[...] += jnp.dot(x, wi_ref[...], preferred_element_type=jnp.float32)


# ------------------------------ host wrappers ------------------------------ #
def _prep_image_operands(params, images, k_tile):
    """Flatten NCHW row-major (like torch), pad M to 8 sublanes and K to the
    derived d_pad.  The weight is expected pre-padded / pre-cast from init."""
    B = images.shape[0]
    x = images.reshape(B, -1)
    d_in = x.shape[1]
    d_pad, tk, nk, num_cores = _k_tiling(d_in, k_tile)
    B_pad = _round_up(max(B, SUBLANE), SUBLANE)
    if (B_pad != B) or (d_pad != d_in):
        x = jnp.pad(x, ((0, B_pad - B), (0, d_pad - d_in)))
    wi = params["wi"]
    if wi.shape[0] != d_pad:
        # Fallback only; init_satellite_params pre-pads so this copy is avoided.
        wi = jnp.pad(wi, ((0, d_pad - wi.shape[0]), (0, 0)))
    wi = wi.astype(jnp.bfloat16)      # no-op when stored bf16 at init
    return x, wi, B, B_pad, d_pad, tk, nk, num_cores


def _image_specs(B_pad, tk, nk_per_core):
    x_spec = pl.BlockSpec((B_pad, tk), lambda c, k: (0, c * nk_per_core + k))
    w_spec = pl.BlockSpec((tk, EMBED), lambda c, k: (c * nk_per_core + k, 0))
    out_spec = pl.BlockSpec((None, B_pad, EMBED), lambda c, k: (c, 0, 0))
    return x_spec, w_spec, out_spec


def _finalize_image(img_parts, bi, B):
    # Tiny XLA epilogue: sum per-core partials, add bias, ReLU.
    return jnp.maximum(jnp.sum(img_parts, axis=0) + bi, 0.0)[:B]


def _forward_with_coords(params, images, coordinates, k_tile):
    x, wi, B, B_pad, d_pad, tk, nk, num_cores = _prep_image_operands(
        params, images, k_tile)
    nk_pc = nk // num_cores

    N = coordinates.shape[1]
    BN = B * N
    BN_pad = _round_up(max(BN, SUBLANE), SUBLANE)
    c = coordinates.reshape(BN, coordinates.shape[-1]).astype(jnp.float32)
    c = jnp.pad(c, ((0, BN_pad - BN), (0, COORD_PAD - c.shape[1])))

    # Mean-pooling as a matmul: pool[b, b*N + j] = 1/N for real points, else 0.
    rows = jax.lax.broadcasted_iota(jnp.int32, (B_pad, BN_pad), 0)
    cols = jax.lax.broadcasted_iota(jnp.int32, (B_pad, BN_pad), 1)
    pool = jnp.where((rows < B) & (cols >= rows * N) & (cols < (rows + 1) * N),
                     jnp.float32(1.0 / N), jnp.float32(0.0))

    x_spec, w_spec, out_spec = _image_specs(B_pad, tk, nk_pc)
    const2 = lambda c_, k_: (0, 0)
    grid_spec = pltpu.PrefetchScalarGridSpec(
        num_scalar_prefetch=0,
        grid=(num_cores, nk_pc),
        in_specs=[
            x_spec, w_spec,
            pl.BlockSpec((BN_pad, COORD_PAD), const2),
            pl.BlockSpec((COORD_PAD, EMBED), const2),
            pl.BlockSpec((1, EMBED), const2),
            pl.BlockSpec((EMBED, EMBED), const2),
            pl.BlockSpec((1, EMBED), const2),
            pl.BlockSpec((B_pad, BN_pad), const2),
        ],
        out_specs=[out_spec, out_spec],
    )
    cost = pl.CostEstimate(
        flops=int(2 * B_pad * d_pad * EMBED
                  + num_cores * (2 * BN_pad * COORD_PAD * EMBED
                                 + 2 * B_pad * BN_pad * EMBED
                                 + 2 * B_pad * EMBED * EMBED)),
        transcendentals=0,
        bytes_accessed=int(d_pad * EMBED * 2                       # bf16 weight
                           + B_pad * d_pad * x.dtype.itemsize
                           + BN_pad * COORD_PAD * 4
                           + (EMBED * EMBED + COORD_PAD * EMBED + 2 * EMBED) * 4
                           + B_pad * BN_pad * 4
                           + 2 * num_cores * B_pad * EMBED * 4),
    )
    img_p, coord_p = pl.pallas_call(
        _fused_coords_kernel,
        out_shape=(jax.ShapeDtypeStruct((num_cores, B_pad, EMBED), jnp.float32),
                   jax.ShapeDtypeStruct((num_cores, B_pad, EMBED), jnp.float32)),
        grid_spec=grid_spec,
        compiler_params=pltpu.CompilerParams(
            dimension_semantics=("parallel", "arbitrary"),   # core split, K reduce
            vmem_limit_bytes=VMEM_LIMIT),
        cost_estimate=cost,
    )(x, wi, c, params["w1"], params["b1"], params["w2"], params["b2"], pool)

    return _finalize_image(img_p, params["bi"], B), coord_p[0, :B]


def _forward_no_coords(params, images, k_tile):
    x, wi, B, B_pad, d_pad, tk, nk, num_cores = _prep_image_operands(
        params, images, k_tile)
    nk_pc = nk // num_cores
    x_spec, w_spec, out_spec = _image_specs(B_pad, tk, nk_pc)
    np_vec = params["no_points"].reshape(1, EMBED).astype(jnp.float32)

    grid_spec = pltpu.PrefetchScalarGridSpec(
        num_scalar_prefetch=0,
        grid=(num_cores, nk_pc),
        in_specs=[x_spec, w_spec,
                  pl.BlockSpec((1, EMBED), lambda c, k: (0, 0))],
        out_specs=[out_spec, out_spec],
    )
    cost = pl.CostEstimate(
        flops=int(2 * B_pad * d_pad * EMBED),
        transcendentals=0,
        bytes_accessed=int(d_pad * EMBED * 2
                           + B_pad * d_pad * x.dtype.itemsize
                           + EMBED * 4
                           + 2 * num_cores * B_pad * EMBED * 4),
    )
    img_p, coord_p = pl.pallas_call(
        _fused_nopoints_kernel,
        out_shape=(jax.ShapeDtypeStruct((num_cores, B_pad, EMBED), jnp.float32),
                   jax.ShapeDtypeStruct((num_cores, B_pad, EMBED), jnp.float32)),
        grid_spec=grid_spec,
        compiler_params=pltpu.CompilerParams(
            dimension_semantics=("parallel", "arbitrary"),
            vmem_limit_bytes=VMEM_LIMIT),
        cost_estimate=cost,
    )(x, wi, np_vec)

    return _finalize_image(img_p, params["bi"], B), coord_p[0, :B]


def satellite_model_forward(params, images, coordinates=None, *, k_tile=K_TILE):
    """Mirrors SatelliteModel.forward: returns (image_features, coord_embedding)."""
    if coordinates is not None and coordinates.shape[1] > 0:
        return _forward_with_coords(params, images, coordinates, k_tile)
    return _forward_no_coords(params, images, k_tile)


# ------------------------------ parameter init ----------------------------- #
def init_satellite_params(key, d_in, k_tile=K_TILE):
    """Builds synthetic encoder params.  The image weight is pre-padded to the
    kernel's d_pad and pre-cast to bf16 HERE (one time), so the per-call
    forward never materializes a padded / cast copy of the dominant operand."""
    d_pad, _, _, _ = _k_tiling(d_in, k_tile)
    ks = jax.random.split(key, 7)
    wi = jax.random.normal(ks[0], (d_in, EMBED), dtype=jnp.float32) * 0.02
    wi = jnp.pad(wi, ((0, d_pad - d_in), (0, 0))).astype(jnp.bfloat16)
    # rows 2..7 of w1 are zero so the padded coordinate columns have no effect.
    w1 = jnp.pad(jax.random.normal(ks[2], (2, EMBED), dtype=jnp.float32) * 0.1,
                 ((0, COORD_PAD - 2), (0, 0)))
    return {
        "wi": wi,
        "bi": jax.random.normal(ks[1], (1, EMBED), dtype=jnp.float32) * 0.02,
        "w1": w1,
        "b1": jax.random.normal(ks[3], (1, EMBED), dtype=jnp.float32) * 0.02,
        "w2": jax.random.normal(ks[4], (EMBED, EMBED), dtype=jnp.float32) * 0.05,
        "b2": jax.random.normal(ks[5], (1, EMBED), dtype=jnp.float32) * 0.02,
        "no_points": jax.random.normal(ks[6], (EMBED,), dtype=jnp.float32),
    }


def _reference(params, images, coordinates):
    """Pure-JAX reference (same bf16 weight / f32 accumulation)."""
    B = images.shape[0]
    x = images.reshape(B, -1)
    d_in = x.shape[1]
    wi = params["wi"][:d_in]
    img = jnp.maximum(
        jnp.dot(x.astype(jnp.bfloat16), wi,
                preferred_element_type=jnp.float32) + params["bi"], 0.0)
    c = jnp.pad(coordinates.astype(jnp.float32),
                ((0, 0), (0, 0), (0, COORD_PAD - coordinates.shape[-1])))
    h = jnp.maximum(jnp.dot(c, params["w1"]) + params["b1"], 0.0)
    coord = jnp.dot(h.mean(axis=1), params["w2"]) + params["b2"]
    return img, coord


# ---------------------------------- main ----------------------------------- #
if __name__ == "__main__":
    key = jax.random.PRNGKey(0)
    kp1, kp2, kd1, kd2, kd3, kd4 = jax.random.split(key, 6)

    # Case 1: spec-sized shapes; D_in=1024 < K_TILE -> single step, grid (1,1).
    B, C, H, W, N_PTS = 2, 4, 16, 16, 8
    images = jax.random.normal(kd1, (B, C, H, W), dtype=jnp.float32)
    coordinates = jax.random.normal(kd2, (B, N_PTS, 2), dtype=jnp.float32)
    params = init_satellite_params(kp1, C * H * W)

    img_feat, coord_emb = satellite_model_forward(params, images, coordinates)
    jax.block_until_ready((img_feat, coord_emb))
    assert img_feat.shape == (B, EMBED) and coord_emb.shape == (B, EMBED)

    ref_img, ref_coord = _reference(params, images, coordinates)
    assert jnp.allclose(img_feat, ref_img, atol=2e-2, rtol=2e-2)
    assert jnp.allclose(coord_emb, ref_coord, atol=5e-3, rtol=5e-3)

    # Case 1b: no coordinates (image encoder + fused no_points broadcast).
    img_feat2, coord_emb2 = satellite_model_forward(params, images, None)
    jax.block_until_ready((img_feat2, coord_emb2))
    assert coord_emb2.shape == (B, EMBED)
    assert jnp.allclose(img_feat2, ref_img, atol=2e-2, rtol=2e-2)
    assert jnp.allclose(
        coord_emb2, jnp.broadcast_to(params["no_points"][None, :], (B, EMBED)))

    # Case 2: bigger D_in with a small forced tile to exercise the K-tiled
    # accumulation and the 2-way core split of the reduction: grid (2, 2).
    C2, H2, W2 = 4, 32, 32
    images2 = jax.random.normal(kd3, (B, C2, H2, W2), dtype=jnp.float32)
    coordinates2 = jax.random.normal(kd4, (B, N_PTS, 2), dtype=jnp.float32)
    params2 = init_satellite_params(kp2, C2 * H2 * W2, k_tile=1024)

    img_feat3, coord_emb3 = satellite_model_forward(
        params2, images2, coordinates2, k_tile=1024)
    jax.block_until_ready((img_feat3, coord_emb3))
    ref_img3, ref_coord3 = _reference(params2, images2, coordinates2)
    assert jnp.allclose(img_feat3, ref_img3, atol=2e-2, rtol=2e-2)
    assert jnp.allclose(coord_emb3, ref_coord3, atol=5e-3, rtol=5e-3)

    print("KERNEL_OK")
</pallas_src>

<mosaic_0001>
module attributes {stable_mosaic.version = 11 : i64} {
  func.func @_fused_coords_kernel(%arg0: i32, %arg1: i32, %arg2: memref<8x1024xf32, #tpu.memory_space<vmem>>, %arg3: memref<1024x128xbf16, #tpu.memory_space<vmem>>, %arg4: memref<16x8xf32, #tpu.memory_space<vmem>>, %arg5: memref<8x128xf32, #tpu.memory_space<vmem>>, %arg6: memref<1x128xf32, #tpu.memory_space<vmem>>, %arg7: memref<128x128xf32, #tpu.memory_space<vmem>>, %arg8: memref<1x128xf32, #tpu.memory_space<vmem>>, %arg9: memref<8x16xf32, #tpu.memory_space<vmem>>, %arg10: memref<1x8x128xf32, #tpu.memory_space<vmem>>, %arg11: memref<1x8x128xf32, #tpu.memory_space<vmem>>) attributes {dimension_semantics = [#tpu.dimension_semantics<parallel>, #tpu.dimension_semantics<arbitrary>], iteration_bounds = array<i64: 1, 1>, scalar_prefetch = 0 : i64, scratch_operands = 0 : i64, tpu.core_type = #tpu.core_type<tc>, window_params = [{transform_indices = @transform_0, window_bounds = array<i64: 8, 1024>}, {transform_indices = @transform_1, window_bounds = array<i64: 1024, 128>}, {pipeline_mode = #tpu.pipeline_mode<synchronous>, transform_indices = @transform_2, window_bounds = array<i64: 16, 8>}, {pipeline_mode = #tpu.pipeline_mode<synchronous>, transform_indices = @transform_3, window_bounds = array<i64: 8, 128>}, {pipeline_mode = #tpu.pipeline_mode<synchronous>, transform_indices = @transform_4, window_bounds = array<i64: 1, 128>}, {pipeline_mode = #tpu.pipeline_mode<synchronous>, transform_indices = @transform_5, window_bounds = array<i64: 128, 128>}, {pipeline_mode = #tpu.pipeline_mode<synchronous>, transform_indices = @transform_6, window_bounds = array<i64: 1, 128>}, {pipeline_mode = #tpu.pipeline_mode<synchronous>, transform_indices = @transform_7, window_bounds = array<i64: 8, 16>}, {transform_indices = @transform_8, window_bounds = array<i64: 1, 8, 128>}, {transform_indices = @transform_9, window_bounds = array<i64: 1, 8, 128>}]} {
    %c0_i32 = arith.constant 0 : i32
    %0 = arith.cmpi eq, %arg1, %c0_i32 : i32
    %1 = arith.extui %0 : i1 to i32
    %c0_i32_0 = arith.constant 0 : i32
    %2 = arith.cmpi ne, %1, %c0_i32_0 : i32
    scf.if %2 {
      %cst_10 = arith.constant 0.000000e+00 : f32
      %13 = vector.broadcast %cst_10 : f32 to vector<8x128xf32>
      %c0_11 = arith.constant 0 : index
      %c0_12 = arith.constant 0 : index
      %c0_13 = arith.constant 0 : index
      %14 = vector.load %arg10[%c0_11, %c0_12, %c0_13] : memref<1x8x128xf32, #tpu.memory_space<vmem>>, vector<1x8x128xf32>
      %15 = vector.shape_cast %14 : vector<1x8x128xf32> to vector<8x128xf32>
      %16 = vector.shape_cast %13 : vector<8x128xf32> to vector<1x8x128xf32>
      tpu.vector_store %arg10[%c0_11, %c0_12, %c0_13], %16 {strides = array<i32>} : memref<1x8x128xf32, #tpu.memory_space<vmem>>, vector<1x8x128xf32>,
      %c0_14 = arith.constant 0 : index
      %c0_15 = arith.constant 0 : index
      %17 = vector.load %arg4[%c0_14, %c0_15] : memref<16x8xf32, #tpu.memory_space<vmem>>, vector<16x8xf32>
      %c0_16 = arith.constant 0 : index
      %c0_17 = arith.constant 0 : index
      %18 = vector.load %arg5[%c0_16, %c0_17] : memref<8x128xf32, #tpu.memory_space<vmem>>, vector<8x128xf32>
      %cst_18 = arith.constant dense<0.000000e+00> : vector<16x128xf32>
      %19 = tpu.matmul %17, %18, %cst_18 {dimension_numbers = #tpu.dot_dimension_numbers<[1], [0], [0], [1], [0, 0, 1, 1], [], []>} : vector<16x8xf32>, vector<8x128xf32>, vector<16x128xf32> -> vector<16x128xf32>
      %c0_19 = arith.constant 0 : index
      %c0_20 = arith.constant 0 : index
      %20 = vector.load %arg6[%c0_19, %c0_20] : memref<1x128xf32, #tpu.memory_space<vmem>>, vector<1x128xf32>
      %21 = vector.broadcast %20 : vector<1x128xf32> to vector<16x128xf32>
      %22 = arith.addf %19, %21 : vector<16x128xf32>
      %cst_21 = arith.constant 0.000000e+00 : f32
      %23 = vector.broadcast %cst_21 : f32 to vector<16x128xf32>
      %24 = arith.maximumf %22, %23 : vector<16x128xf32>
      %c0_22 = arith.constant 0 : index
      %c0_23 = arith.constant 0 : index
      %25 = vector.load %arg9[%c0_22, %c0_23] : memref<8x16xf32, #tpu.memory_space<vmem>>, vector<8x16xf32>
      %cst_24 = arith.constant dense<0.000000e+00> : vector<8x128xf32>
      %26 = tpu.matmul %25, %24, %cst_24 {dimension_numbers = #tpu.dot_dimension_numbers<[1], [0], [0], [1], [0, 0, 1, 1], [], []>} : vector<8x16xf32>, vector<16x128xf32>, vector<8x128xf32> -> vector<8x128xf32>
      %c0_25 = arith.constant 0 : index
      %c0_26 = arith.constant 0 : index
      %27 = vector.load %arg7[%c0_25, %c0_26] : memref<128x128xf32, #tpu.memory_space<vmem>>, vector<128x128xf32>
      %cst_27 = arith.constant dense<0.000000e+00> : vector<8x128xf32>
      %28 = tpu.matmul %26, %27, %cst_27 {dimension_numbers = #tpu.dot_dimension_numbers<[1], [0], [0], [1], [0, 0, 1, 1], [], []>} : vector<8x128xf32>, vector<128x128xf32>, vector<8x128xf32> -> vector<8x128xf32>
      %c0_28 = arith.constant 0 : index
      %c0_29 = arith.constant 0 : index
      %29 = vector.load %arg8[%c0_28, %c0_29] : memref<1x128xf32, #tpu.memory_space<vmem>>, vector<1x128xf32>
      %30 = vector.broadcast %29 : vector<1x128xf32> to vector<8x128xf32>
      %31 = arith.addf %28, %30 : vector<8x128xf32>
      %c0_30 = arith.constant 0 : index
      %c0_31 = arith.constant 0 : index
      %c0_32 = arith.constant 0 : index
      %32 = vector.load %arg11[%c0_30, %c0_31, %c0_32] : memref<1x8x128xf32, #tpu.memory_space<vmem>>, vector<1x8x128xf32>
      %33 = vector.shape_cast %32 : vector<1x8x128xf32> to vector<8x128xf32>
      %34 = vector.shape_cast %31 : vector<8x128xf32> to vector<1x8x128xf32>
      tpu.vector_store %arg11[%c0_30, %c0_31, %c0_32], %34 {strides = array<i32>} : memref<1x8x128xf32, #tpu.memory_space<vmem>>, vector<1x8x128xf32>,
    } else {
    }
    %c0 = arith.constant 0 : index
    %c0_1 = arith.constant 0 : index
    %3 = vector.load %arg2[%c0, %c0_1] : memref<8x1024xf32, #tpu.memory_space<vmem>>, vector<8x1024xf32>
    %4 = arith.truncf %3 : vector<8x1024xf32> to vector<8x1024xbf16>
    %c0_2 = arith.constant 0 : index
    %c0_3 = arith.constant 0 : index
    %c0_4 = arith.constant 0 : index
    %5 = vector.load %arg10[%c0_2, %c0_3, %c0_4] : memref<1x8x128xf32, #tpu.memory_space<vmem>>, vector<1x8x128xf32>
    %6 = vector.shape_cast %5 : vector<1x8x128xf32> to vector<8x128xf32>
    %c0_5 = arith.constant 0 : index
    %c0_6 = arith.constant 0 : index
    %7 = vector.load %arg3[%c0_5, %c0_6] : memref<1024x128xbf16, #tpu.memory_space<vmem>>, vector<1024x128xbf16>
    %cst = arith.constant dense<0.000000e+00> : vector<8x128xf32>
    %8 = tpu.matmul %4, %7, %cst {dimension_numbers = #tpu.dot_dimension_numbers<[1], [0], [0], [1], [0, 0, 1, 1], [], []>} : vector<8x1024xbf16>, vector<1024x128xbf16>, vector<8x128xf32> -> vector<8x128xf32>
    %9 = arith.addf %6, %8 : vector<8x128xf32>
    %c0_7 = arith.constant 0 : index
    %c0_8 = arith.constant 0 : index
    %c0_9 = arith.constant 0 : index
    %10 = vector.load %arg10[%c0_7, %c0_8, %c0_9] : memref<1x8x128xf32, #tpu.memory_space<vmem>>, vector<1x8x128xf32>
    %11 = vector.shape_cast %10 : vector<1x8x128xf32> to vector<8x128xf32>
    %12 = vector.shape_cast %9 : vector<8x128xf32> to vector<1x8x128xf32>
    tpu.vector_store %arg10[%c0_7, %c0_8, %c0_9], %12 {strides = array<i32>} : memref<1x8x128xf32, #tpu.memory_space<vmem>>, vector<1x8x128xf32>,
    return
  }
  func.func @transform_0(%arg0: i32, %arg1: i32) -> (i32, i32) {
    %c1_i32 = arith.constant 1 : i32
    %0 = arith.muli %arg0, %c1_i32 : i32
    %1 = arith.addi %0, %arg1 : i32
    %c0_i32 = arith.constant 0 : i32
    %c0_i32_0 = arith.constant 0 : i32
    return %c0_i32, %1 : i32, i32
  }
  func.func @transform_1(%arg0: i32, %arg1: i32) -> (i32, i32) {
    %c1_i32 = arith.constant 1 : i32
    %0 = arith.muli %arg0, %c1_i32 : i32
    %1 = arith.addi %0, %arg1 : i32
    %c0_i32 = arith.constant 0 : i32
    %c0_i32_0 = arith.constant 0 : i32
    return %1, %c0_i32 : i32, i32
  }
  func.func @transform_2(%arg0: i32, %arg1: i32) -> (i32, i32) {
    %c0_i32 = arith.constant 0 : i32
    %c0_i32_0 = arith.constant 0 : i32
    %c0_i32_1 = arith.constant 0 : i32
    return %c0_i32, %c0_i32_0 : i32, i32
  }
  func.func @transform_3(%arg0: i32, %arg1: i32) -> (i32, i32) {
    %c0_i32 = arith.constant 0 : i32
    %c0_i32_0 = arith.constant 0 : i32
    %c0_i32_1 = arith.constant 0 : i32
    return %c0_i32, %c0_i32_0 : i32, i32
  }
  func.func @transform_4(%arg0: i32, %arg1: i32) -> (i32, i32) {
    %c0_i32 = arith.constant 0 : i32
    %c0_i32_0 = arith.constant 0 : i32
    %c0_i32_1 = arith.constant 0 : i32
    return %c0_i32, %c0_i32_0 : i32, i32
  }
  func.func @transform_5(%arg0: i32, %arg1: i32) -> (i32, i32) {
    %c0_i32 = arith.constant 0 : i32
    %c0_i32_0 = arith.constant 0 : i32
    %c0_i32_1 = arith.constant 0 : i32
    return %c0_i32, %c0_i32_0 : i32, i32
  }
  func.func @transform_6(%arg0: i32, %arg1: i32) -> (i32, i32) {
    %c0_i32 = arith.constant 0 : i32
    %c0_i32_0 = arith.constant 0 : i32
    %c0_i32_1 = arith.constant 0 : i32
    return %c0_i32, %c0_i32_0 : i32, i32
  }
  func.func @transform_7(%arg0: i32, %arg1: i32) -> (i32, i32) {
    %c0_i32 = arith.constant 0 : i32
    %c0_i32_0 = arith.constant 0 : i32
    %c0_i32_1 = arith.constant 0 : i32
    return %c0_i32, %c0_i32_0 : i32, i32
  }
  func.func @transform_8(%arg0: i32, %arg1: i32) -> (i32, i32, i32) {
    %c0_i32 = arith.constant 0 : i32
    %c0_i32_0 = arith.constant 0 : i32
    %c0_i32_1 = arith.constant 0 : i32
    return %arg0, %c0_i32, %c0_i32_0 : i32, i32, i32
  }
  func.func @transform_9(%arg0: i32, %arg1: i32) -> (i32, i32, i32) {
    %c0_i32 = arith.constant 0 : i32
    %c0_i32_0 = arith.constant 0 : i32
    %c0_i32_1 = arith.constant 0 : i32
    return %arg0, %c0_i32, %c0_i32_0 : i32, i32, i32
  }
}

</mosaic_0001>

<bundles_post_ra>
// kernel: tpu_custom_call.1
= control target key start
LH: loop header
LB: loop body
LE: loop exit
PB: predicated region body
PF: predicated region fallthrough
CT: control target
= control target key end

     0   :  { %15 = vsyncpa [#allocation3], 0  ;;  %s1598_s0 = inlined_call_operand.hbm [shape: f32[8,1024], index: 0, kind: input, shape index: {}]   ;;  %s1599_s1 = inlined_call_operand.hbm [shape: bf16[1024,128], index: 1, kind: input, shape index: {}]   ;;  %s1600_s2 = inlined_call_operand.vmem [shape: f32[16,8], index: 2, kind: input, shape index: {}]   ;;  %s1601_s3 = inlined_call_operand.vmem [shape: f32[8,128], index: 3, kind: input, shape index: {}]   ;;  %s1602_s4 = inlined_call_operand.vmem [shape: f32[1,128], index: 4, kind: input, shape index: {}]   ;;  %s1603_s5 = inlined_call_operand.hbm [shape: f32[128,128], index: 5, kind: input, shape index: {}]   ;;  %s1604_s6 = inlined_call_operand.vmem [shape: f32[1,128], index: 6, kind: input, shape index: {}]   ;;  %s1605_s7 = inlined_call_operand.vmem [shape: f32[8,16], index: 7, kind: input, shape index: {}]   ;;  %s1606_s8 = inlined_call_operand.hbm [shape: f32[1,8,128], index: 8, kind: output, shape index: {0}]   ;;  %s1607_s9 = inlined_call_operand.hbm [shape: f32[1,8,128], index: 9, kind: output, shape index: {1}]  }
   0x1   :  { %16 = vsyncpa [#allocation6], 0 }
   0x2   :  { %17 = vsyncpa [#allocation4], 0 }
   0x3   :  { %18 = vsyncpa [#allocation10], 0  ;;  %s1484_s30 = smov [#allocation5]  }
   0x4   :  { %s42_s10 = sshll.u32 %s1484_s30, 4  ;;  %s43_s10 = int_to_ptr.vmem [resolvable:$true] %s42_s10 }
   0x5   :  { %s1384_s11 = scalar_lea.vmem %s43_s10, 8192  ;;  %p1389_p1 = scmp.lt.s32.totalorder %s43_s10, %s43_s10 }
   0x6   :  { %p1385_p0 = scmp.ne.s32.totalorder %s43_s10, %s1384_s11  ;;  %p1390_p2 = scmp.lt.s32.totalorder %s1384_s11, %s1384_s11 }
   0x8   :  { %p1391_p3 = por %p1390_p2, %p1389_p1 }
   0xa   :  { %p1392_p4 = pnand %p1391_p3, %p1385_p0 }
   0xc   :  { %1395 = shalt.err (!%p1392_p4)
}
   0xd   :  { %s1485_s12 = smov 64   ;;  %s1486_s13 = smov 4  }
   0xe   :  { %48 = dma.hbm_to_vmem [thread:$0]  %s1599_s1, 8192, %s43_s10, [#allocation6], %s1485_s12, %s1485_s12, %s1486_s13  }
   0xf   :  { %s1487_s16 = smov [#allocation2]   ;;  %s1488_s18 = smov [#allocation7]  }
  0x10   :  { %s29_s17 = sshll.u32 %s1487_s16, 4  ;;  %s60_s19 = sshll.u32 %s1488_s18, 4  ;;  %s30_s17 = int_to_ptr.vmem [resolvable:$true] %s29_s17  ;;  %s61_s19 = int_to_ptr.vmem [resolvable:$true] %s60_s19 }
  0x11   :  { %s1404_s20 = scalar_lea.vmem %s30_s17, 1024  ;;  %p1409_p6 = scmp.lt.s32.totalorder %s30_s17, %s30_s17 }
  0x12   :  { %p1405_p5 = scmp.ne.s32.totalorder %s30_s17, %s1404_s20  ;;  %p1410_p7 = scmp.lt.s32.totalorder %s1404_s20, %s1404_s20 }
  0x14   :  { %p1411_p8 = por %p1410_p7, %p1409_p6 }
  0x16   :  { %p1412_p9 = pnand %p1411_p8, %p1405_p5 }
  0x18   :  { %1415 = shalt.err (!%p1412_p9)
}
  0x19   :  { %32 = dma.hbm_to_vmem [thread:$0]  %s1598_s0, 1024, %s30_s17, [#allocation3]  }
  0x1a   :  { %s1424_s23 = scalar_lea.vmem %s61_s19, 2048  ;;  %p1429_p11 = scmp.lt.s32.totalorder %s61_s19, %s61_s19 }
  0x1b   :  { %p1425_p10 = scmp.ne.s32.totalorder %s61_s19, %s1424_s23  ;;  %p1430_p12 = scmp.lt.s32.totalorder %s1424_s23, %s1424_s23 }
  0x1d   :  { %p1431_p13 = por %p1430_p12, %p1429_p11 }
  0x1f   :  { %p1432_p0 = pnand %p1431_p13, %p1425_p10 }
  0x21   :  { %1435 = shalt.err (!%p1432_p0)
}
  0x22   :  { %s1489_s1 = smov 128   ;;  %s1490_s24 = smov 8  }
  0x23   :  { %66 = dma.hbm_to_vmem [thread:$0]  %s1603_s5, 2048, %s61_s19, [#allocation6], %s1489_s1, %s1489_s1, %s1490_s24  }
  0x24   :  { %1476 = dma.done.wait [#allocation3], 1024  }
  0x25   :  { %1477 = vsyncadd [#allocation3], 4294966272 }
  0x26   :  { %1478 = dma.done.wait [#allocation6], 10240  }
  0x27   :  { %1479 = vsyncadd [#allocation6], 4294957056  ;;  %vm100_vm0 = vcmask 64512   ;;  %v92_v0 = vld [vmem:[%s1601_s3] sm:$0xff]  ;;  %v91_v2 = vld [vmem:[%s1600_s2 + $0x8] sm:$0xff]  ;;  %v1491_v3 = vmov 0.0  }
  0x28   :  { %v90_v1 = vld [vmem:[%s1600_s2] sm:$0xff]  ;;  %1254 = vmatprep.subr.mxu1 %v92_v0  ;;  %1266 = vmatprep.subr.mxu0 %v1491_v3  ;;  %vm1492_vm1 = vmmov 0   ;;  %v274_v4 = vld [vmem:[#allocation7 + $0x78] sm:$0xff]  ;;  %v273_v5 = vld [vmem:[#allocation7 + $0x70] sm:$0xff]  ;;  %vm185_vm2 = vcmask 130048   ;;  %s1493_s12 = smov [#allocation9]  }
  0x29   :  { %1256 = vmatprep.mubr.msk.f32.mxu1 %vm100_vm0, %v90_v1  ;;  %1255 = vmatpush3.msra.mxu1 %v92_v0  ;;  %v272_v6 = vld [vmem:[#allocation7 + $0x68] sm:$0xff]  ;;  %v271_v7 = vld [vmem:[#allocation7 + $0x60] sm:$0xff]  ;;  %v270_v8 = vld [vmem:[#allocation7 + $0x58] sm:$0xff]  ;;  %s1060_s13 = sshll.u32 %s1493_s12, 4  ;;  %s1061_s13 = int_to_ptr.vmem [resolvable:$true] %s1060_s13 }
  0x2a   :  { %1257 = vmatmul.mubr.msk.f32.vlgmr.msra.gmra.mxu1 %vm100_vm0, %v91_v2  ;;  %1259 = vmatprep.subr.mxu1 %v1491_v3  ;;  %v269_v9 = vld [vmem:[#allocation7 + $0x50] sm:$0xff]  ;;  %v268_v10 = vld [vmem:[#allocation7 + $0x48] sm:$0xff]  ;;  %v267_v11 = vld [vmem:[#allocation7 + $0x40] sm:$0xff]  ;;  %s1436_s14 = scalar_lea.vmem %s1061_s13, 128  ;;  %p1441_p2 = scmp.lt.s32.totalorder %s1061_s13, %s1061_s13 }
  0x2b   :  { %1263 = vmatprep.mubr.msk.f32.mxu1 %vm1492_vm1, %v1491_v3  ;;  %1298 = vmatprep.mubr.msk.f32.mxu0 %vm1492_vm1, %v1491_v3  ;;  %v266_v12 = vld [vmem:[#allocation7 + $0x38] sm:$0xff]  ;;  %v265_v13 = vld [vmem:[#allocation7 + $0x30] sm:$0xff]  ;;  %v264_v14 = vld [vmem:[#allocation7 + $0x28] sm:$0xff]  ;;  %p1437_p1 = scmp.ne.s32.totalorder %s1061_s13, %s1436_s14  ;;  %p1442_p3 = scmp.lt.s32.totalorder %s1436_s14, %s1436_s14 }
  0x2c   :  { %1267 = vmatpush3.msra.mxu0 %v274_v4  ;;  %v263_v15 = vld [vmem:[#allocation7 + $0x20] sm:$0xff]  ;;  %v262_v16 = vld [vmem:[#allocation7 + $0x18] sm:$0xff]  ;;  %v261_v17 = vld [vmem:[#allocation7 + $0x10] sm:$0xff] }
  0x2d   :  { %1268 = vmatprep.subr.mxu0 %v1491_v3  ;;  %v260_v18 = vld [vmem:[#allocation7 + $0x8] sm:$0xff]  ;;  %v259_v19 = vld [vmem:[#allocation7] sm:$0xff]  ;;  %v1312_v26 = vld [vmem:[#allocation5 + $0x78] sm:$0xff]   ;;  %p1443_p4 = por %p1442_p3, %p1441_p2 }
  0x2e   :  { %1269 = vmatpush3.msra.mxu0 %v273_v5  ;;  %v1074_v20 = vld [vmem:[%s1602_s4] ss:$0 sm:$0xff]  ;;  %v1313_v29 = vld [vmem:[#allocation5 + $0x38] sm:$0xff]   ;;  %v1314_v30 = vld [vmem:[#allocation5 + $0x70] sm:$0xff]  }
  0x2f   :  { %1270 = vmatprep.subr.mxu0 %v1491_v3  ;;  %v184_v28 = vld [vmem:[%s1605_s7] sm:$0xff]  ;;  %v1315_v31 = vld [vmem:[#allocation5 + $0x30] sm:$0xff]   ;;  %v1316_v32 = vld [vmem:[#allocation5 + $0x68] sm:$0xff]   ;;  %p1444_p5 = pnand %p1443_p4, %p1437_p1 }
  0x30   :  { %1271 = vmatpush3.msra.mxu0 %v272_v6  ;;  %v1317_v33 = vld [vmem:[#allocation5 + $0x28] sm:$0xff]   ;;  %v1318_v34 = vld [vmem:[#allocation5 + $0x60] sm:$0xff]   ;;  %v1320_v36 = vld [vmem:[#allocation5 + $0x58] sm:$0xff]  }
  0x31   :  { %1272 = vmatprep.subr.mxu0 %v1491_v3  ;;  %v1319_v35 = vld [vmem:[#allocation5 + $0x20] sm:$0xff]   ;;  %v1321_v37 = vld [vmem:[#allocation5 + $0x18] sm:$0xff]   ;;  %v1322_v38 = vld [vmem:[#allocation5 + $0x50] sm:$0xff]  }
  0x32   :  { %1273 = vmatpush3.msra.mxu0 %v271_v7  ;;  %v1323_v39 = vld [vmem:[#allocation5 + $0x10] sm:$0xff]   ;;  %v1324_v40 = vld [vmem:[#allocation5 + $0x48] sm:$0xff]   ;;  %v1326_v42 = vld [vmem:[#allocation5 + $0x40] sm:$0xff]  }
  0x33   :  { %1274 = vmatprep.subr.mxu0 %v1491_v3  ;;  %v1325_v41 = vld [vmem:[#allocation5 + $0x8] sm:$0xff]   ;;  %v1327_v43 = vld [vmem:[#allocation5] sm:$0xff]   ;;  %v1328_v44 = vld [vmem:[#allocation5 + $0xf8] sm:$0xff]  }
  0x34   :  { %1275 = vmatpush3.msra.mxu0 %v270_v8  ;;  %v354_v45 = vld [vmem:[#allocation2 + $0x8] sm:$0xff]  ;;  %v1330_v47 = vld [vmem:[#allocation5 + $0x178] sm:$0xff]   ;;  %v353_v48 = vld [vmem:[#allocation2] sm:$0xff] }
  0x35   :  { %1276 = vmatprep.subr.mxu0 %v1491_v3  ;;  %v362_v46 = vpack.c.bf16 %v354_v45, %v354_v45  ;;  %v361_v49 = vpack.c.bf16 %v353_v48, %v353_v48  ;;  %v1331_v50 = vld [vmem:[#allocation5 + $0x138] sm:$0xff]   ;;  %v1334_v51 = vld [vmem:[#allocation5 + $0x170] sm:$0xff]   ;;  %v1338_v53 = vld [vmem:[#allocation5 + $0x168] sm:$0xff]  }
  0x36   :  { %1277 = vmatpush3.msra.mxu0 %v269_v9  ;;  %v1335_v52 = vld [vmem:[#allocation5 + $0x130] sm:$0xff]   ;;  %v1339_v54 = vld [vmem:[#allocation5 + $0x128] sm:$0xff]   ;;  %v1342_v55 = vld [vmem:[#allocation5 + $0x160] sm:$0xff]  }
  0x37   :  { %1278 = vmatprep.subr.mxu0 %v1491_v3  ;;  %v1343_v56 = vld [vmem:[#allocation5 + $0x120] sm:$0xff]   ;;  %v1346_v57 = vld [vmem:[#allocation5 + $0x158] sm:$0xff]   ;;  %v1350_v59 = vld [vmem:[#allocation5 + $0x150] sm:$0xff]  }
  0x38   :  { %1279 = vmatpush3.msra.mxu0 %v268_v10  ;;  %v1347_v58 = vld [vmem:[#allocation5 + $0x118] sm:$0xff]   ;;  %v1351_v60 = vld [vmem:[#allocation5 + $0x110] sm:$0xff]   ;;  %v1354_v61 = vld [vmem:[#allocation5 + $0x148] sm:$0xff]  }
  0x39   :  { %1280 = vmatprep.subr.mxu0 %v1491_v3  ;;  %v1355_v62 = vld [vmem:[#allocation5 + $0x108] sm:$0xff]   ;;  %v1358_v63 = vld [vmem:[#allocation5 + $0x140] sm:$0xff]   ;;  %v356_v5 = vld [vmem:[#allocation2 + $0x18] sm:$0xff] }
  0x3a   :  { %1281 = vmatpush3.msra.mxu0 %v267_v11  ;;  %v1359_v0 = vld [vmem:[#allocation5 + $0x100] sm:$0xff]   ;;  %v358_v1 = vld [vmem:[#allocation2 + $0x28] sm:$0xff]  ;;  %v1329_v6 = vld [vmem:[#allocation5 + $0xb8] sm:$0xff]   ;;  %v364_v7 = vpack.c.bf16 %v356_v5, %v356_v5 }
  0x3b   :  { %1282 = vmatprep.subr.mxu0 %v1491_v3  ;;  %v366_v2 = vpack.c.bf16 %v358_v1, %v358_v1  ;;  %v1332_v8 = vld [vmem:[#allocation5 + $0xf0] sm:$0xff]  }
  0x3c   :  { %1283 = vmatpush3.msra.mxu0 %v266_v12  ;;  %v1333_v11 = vld [vmem:[#allocation5 + $0xb0] sm:$0xff]   ;;  %v1336_v12 = vld [vmem:[#allocation5 + $0xe8] sm:$0xff]  }
  0x3d   :  { %1284 = vmatprep.subr.mxu0 %v1491_v3 }
  0x3e   :  { %1285 = vmatpush3.msra.mxu0 %v265_v13  ;;  %v1337_v13 = vld [vmem:[#allocation5 + $0xa8] sm:$0xff]  }
  0x3f   :  { %1286 = vmatprep.subr.mxu0 %v1491_v3 }
  0x40   :  { %1287 = vmatpush3.msra.mxu0 %v264_v14  ;;  %v1340_v14 = vld [vmem:[#allocation5 + $0xe0] sm:$0xff]  }
  0x41   :  { %1288 = vmatprep.subr.mxu0 %v1491_v3 }
  0x42   :  { %1289 = vmatpush3.msra.mxu0 %v263_v15  ;;  %v1341_v15 = vld [vmem:[#allocation5 + $0xa0] sm:$0xff]  }
  0x43   :  { %1290 = vmatprep.subr.mxu0 %v1491_v3 }
  0x44   :  { %1291 = vmatpush3.msra.mxu0 %v262_v16  ;;  %v1344_v16 = vld [vmem:[#allocation5 + $0xd8] sm:$0xff]  }
  0x45   :  { %1292 = vmatprep.subr.mxu0 %v1491_v3 }
  0x46   :  { %1293 = vmatpush3.msra.mxu0 %v261_v17  ;;  %v1345_v17 = vld [vmem:[#allocation5 + $0x98] sm:$0xff]  }
  0x47   :  { %1294 = vmatprep.subr.mxu0 %v1491_v3 }
  0x48   :  { %1295 = vmatpush3.msra.mxu0 %v260_v18  ;;  %v1348_v18 = vld [vmem:[#allocation5 + $0xd0] sm:$0xff]  }
  0x49   :  { %1296 = vmatprep.subr.mxu0 %v1491_v3 }
  0x4a   :  { %1297 = vmatpush3.msra.mxu0 %v259_v19  ;;  %v1349_v19 = vld [vmem:[#allocation5 + $0x90] sm:$0xff]  }
  0x4b   :  { %1188 = vmatprep.subr.bf16.mxu0 %v1328_v44  ;;  %v359_v44 = vld [vmem:[#allocation2 + $0x30] sm:$0xff] }
  0x4c   :  { %v367_v45 = vpack.c.bf16 %v359_v44, %v359_v44 }
  0xea   :  { %v1258_v21 = vpop.f32.mrf.mxu1 }
  0xeb   :  { %v179_v22 = vadd.f32 %v1258_v21, %v1074_v20  ;;  %v1353_v21 = vld [vmem:[#allocation5 + $0x88] sm:$0xff]  }
  0xec   :  { %v173_v23 = vpop.f32.mrf.mxu1 }
  0xed   :  { %v183_v24 = vmax.f32 %v179_v22, 0.0  ;;  %v174_v25 = vadd.f32 %v1074_v20, %v173_v23  ;;  %v1352_v20 = vld [vmem:[#allocation5 + $0xc8] sm:$0xff]   ;;  %v1356_v22 = vld [vmem:[#allocation5 + $0xc0] sm:$0xff]  }
  0xee   :  { %v1357_v23 = vld [vmem:[#allocation5 + $0x80] sm:$0xff]  }
  0xef   :  { %v182_v27 = vmax.f32 %v174_v25, 0.0  ;;  %1260 = vmatpush3.msra.mxu1 %v183_v24  ;;  %v355_v24 = vld [vmem:[#allocation2 + $0x10] sm:$0xff]  ;;  %v1360_v25 = vld [vmem:[#allocation5 + $0x1f8] sm:$0xff]  }
  0xf0   :  { %1261 = vmatprep.subr.mxu1 %v1491_v3  ;;  %v357_v3 = vld [vmem:[#allocation2 + $0x20] sm:$0xff] }
  0xf1   :  { %1262 = vmatpush3.msra.mxu1 %v182_v27  ;;  %v365_v4 = vpack.c.bf16 %v357_v3, %v357_v3  ;;  %v363_v27 = vpack.c.bf16 %v355_v24, %v355_v24 }
  0xf2   :  { %1264 = vmatmul.mubr.msk.f32.vlgmr.msra.gmra.mxu1 %vm185_vm2, %v184_v28  ;;  %1166 = vmatprep.subr.bf16.mxu1 %v1312_v26  ;;  %v360_v26 = vld [vmem:[#allocation2 + $0x38] sm:$0xff] }
  0xf3   :  { %1167 = vmatpush3.bf16.msra.mxu1 %v1313_v29  ;;  %914 = vmatprep.mubr.bf16.mxu1 %v362_v46  ;;  %v1361_v28 = vld [vmem:[#allocation5 + $0x1b8] sm:$0xff]   ;;  %v368_v29 = vpack.c.bf16 %v360_v26, %v360_v26 }
  0xf4   :  { %1168 = vmatprep.subr.bf16.mxu1 %v1314_v30  ;;  %v1362_v30 = vld [vmem:[#allocation5 + $0x1f0] sm:$0xff]  }
  0xf7   :  { %1169 = vmatpush3.bf16.msra.mxu1 %v1315_v31  ;;  %v1363_v31 = vld [vmem:[#allocation5 + $0x1b0] sm:$0xff]  }
  0xf8   :  { %1170 = vmatprep.subr.bf16.mxu1 %v1316_v32  ;;  %v1364_v32 = vld [vmem:[#allocation5 + $0x1e8] sm:$0xff]  }
  0xfb   :  { %1171 = vmatpush3.bf16.msra.mxu1 %v1317_v33  ;;  %v1365_v33 = vld [vmem:[#allocation5 + $0x1a8] sm:$0xff]  }
  0xfc   :  { %1172 = vmatprep.subr.bf16.mxu1 %v1318_v34  ;;  %v1366_v34 = vld [vmem:[#allocation5 + $0x1e0] sm:$0xff]  }
  0xff   :  { %1173 = vmatpush3.bf16.msra.mxu1 %v1319_v35  ;;  %v1367_v35 = vld [vmem:[#allocation5 + $0x1a0] sm:$0xff]  }
 0x100   :  { %1174 = vmatprep.subr.bf16.mxu1 %v1320_v36  ;;  %v1368_v36 = vld [vmem:[#allocation5 + $0x1d8] sm:$0xff]  }
 0x103   :  { %1175 = vmatpush3.bf16.msra.mxu1 %v1321_v37  ;;  %v1369_v37 = vld [vmem:[#allocation5 + $0x198] sm:$0xff]  }
 0x104   :  { %1176 = vmatprep.subr.bf16.mxu1 %v1322_v38  ;;  %v1370_v38 = vld [vmem:[#allocation5 + $0x1d0] sm:$0xff]  }
 0x107   :  { %1177 = vmatpush3.bf16.msra.mxu1 %v1323_v39  ;;  %v1371_v39 = vld [vmem:[#allocation5 + $0x190] sm:$0xff]  }
 0x108   :  { %1178 = vmatprep.subr.bf16.mxu1 %v1324_v40  ;;  %v1372_v40 = vld [vmem:[#allocation5 + $0x1c8] sm:$0xff]  }
 0x10b   :  { %1179 = vmatpush3.bf16.msra.mxu1 %v1325_v41  ;;  %v1373_v41 = vld [vmem:[#allocation5 + $0x188] sm:$0xff]  }
 0x10c   :  { %1180 = vmatprep.subr.bf16.mxu1 %v1326_v42  ;;  %v1374_v42 = vld [vmem:[#allocation5 + $0x1c0] sm:$0xff]  }
 0x10f   :  { %1181 = vmatpush3.bf16.msra.mxu1 %v1327_v43  ;;  %v1375_v43 = vld [vmem:[#allocation5 + $0x180] sm:$0xff]  }
 0x110   :  { %1210 = vmatprep.subr.bf16.mxu1 %v1330_v47 }
 0x112   :  { %915 = vmatmul.mubr.bf16.vlgmr.msra.gmra.mxu1 %v361_v49 }
 0x113   :  { %1211 = vmatpush3.bf16.msra.mxu1 %v1331_v50  ;;  %994 = vmatprep.mubr.bf16.mxu1 %v366_v2 }
 0x114   :  { %1212 = vmatprep.subr.bf16.mxu1 %v1334_v51 }
 0x117   :  { %1213 = vmatpush3.bf16.msra.mxu1 %v1335_v52 }
 0x118   :  { %1214 = vmatprep.subr.bf16.mxu1 %v1338_v53 }
 0x11b   :  { %1215 = vmatpush3.bf16.msra.mxu1 %v1339_v54 }
 0x11c   :  { %1216 = vmatprep.subr.bf16.mxu1 %v1342_v55 }
 0x11f   :  { %1217 = vmatpush3.bf16.msra.mxu1 %v1343_v56  ;;  %v1078_v56 = vld [vmem:[%s1604_s6] ss:$0 sm:$0xff] }
 0x120   :  { %1218 = vmatprep.subr.bf16.mxu1 %v1346_v57 }
 0x123   :  { %1219 = vmatpush3.bf16.msra.mxu1 %v1347_v58 }
 0x124   :  { %1220 = vmatprep.subr.bf16.mxu1 %v1350_v59 }
 0x127   :  { %1221 = vmatpush3.bf16.msra.mxu1 %v1351_v60 }
 0x128   :  { %1222 = vmatprep.subr.bf16.mxu1 %v1354_v61 }
 0x12b   :  { %1223 = vmatpush3.bf16.msra.mxu1 %v1355_v62 }
 0x12c   :  { %1224 = vmatprep.subr.bf16.mxu1 %v1358_v63 }
 0x12f   :  { %1225 = vmatpush3.bf16.msra.mxu1 %v1359_v0 }
 0x132   :  { %995 = vmatmul.mubr.bf16.vlgmr.msra.gmra.mxu1 %v365_v4 }
 0x1b2   :  { %v255_v9 = vpop.f32.mrf.mxu1 }
 0x1b3   :  { %1299 = vmatmul.mubr.f32.vlgmr.msra.gmra.mxu0 %v255_v9 }
 0x1b4   :  { %1189 = vmatpush3.bf16.msra.mxu0 %v1329_v6  ;;  %v1265_v10 = vpop.f32.mrf.mxu1  ;;  %954 = vmatprep.mubr.bf16.mxu0 %v364_v7 }
 0x1b5   :  { %1190 = vmatprep.subr.bf16.mxu0 %v1332_v8 }
 0x1b8   :  { %1191 = vmatpush3.bf16.msra.mxu0 %v1333_v11 }
 0x1b9   :  { %1192 = vmatprep.subr.bf16.mxu0 %v1336_v12 }
 0x1bc   :  { %1193 = vmatpush3.bf16.msra.mxu0 %v1337_v13 }
 0x1bd   :  { %1194 = vmatprep.subr.bf16.mxu0 %v1340_v14 }
 0x1c0   :  { %1195 = vmatpush3.bf16.msra.mxu0 %v1341_v15 }
 0x1c1   :  { %1196 = vmatprep.subr.bf16.mxu0 %v1344_v16 }
 0x1c4   :  { %1197 = vmatpush3.bf16.msra.mxu0 %v1345_v17 }
 0x1c5   :  { %1198 = vmatprep.subr.bf16.mxu0 %v1348_v18 }
 0x1c8   :  { %1199 = vmatpush3.bf16.msra.mxu0 %v1349_v19 }
 0x1c9   :  { %1200 = vmatprep.subr.bf16.mxu0 %v1352_v20 }
 0x1cc   :  { %1201 = vmatpush3.bf16.msra.mxu0 %v1353_v21 }
 0x1cd   :  { %1202 = vmatprep.subr.bf16.mxu0 %v1356_v22 }
 0x1d0   :  { %1203 = vmatpush3.bf16.msra.mxu0 %v1357_v23 }
 0x1d1   :  { %1232 = vmatprep.subr.bf16.mxu0 %v1360_v25 }
 0x1d2   :  { %v1182_v46 = vpop.f32.mrf.mxu1 }
 0x1d3   :  { %955 = vmatmul.mubr.bf16.vlgmr.msra.gmra.mxu0 %v363_v27 }
 0x1d4   :  { %1233 = vmatpush3.bf16.msra.mxu0 %v1361_v28  ;;  %1034 = vmatprep.mubr.bf16.mxu0 %v368_v29  ;;  %v1183_v47 = vpop.f32.mrf.mxu1 }
 0x1d5   :  { %1234 = vmatprep.subr.bf16.mxu0 %v1362_v30  ;;  %v1184_v48 = vadd.f32 %v1183_v47, %v1182_v46 }
 0x1d6   :  { %v1185_v49 = vpop.f32.mrf.mxu1 }
 0x1d8   :  { %1235 = vmatpush3.bf16.msra.mxu0 %v1363_v31  ;;  %v1186_v50 = vpop.f32.mrf.mxu1 }
 0x1d9   :  { %1236 = vmatprep.subr.bf16.mxu0 %v1364_v32 }
 0x1dc   :  { %1237 = vmatpush3.bf16.msra.mxu0 %v1365_v33 }
 0x1dd   :  { %1238 = vmatprep.subr.bf16.mxu0 %v1366_v34 }
 0x1e0   :  { %1239 = vmatpush3.bf16.msra.mxu0 %v1367_v35 }
 0x1e1   :  { %1240 = vmatprep.subr.bf16.mxu0 %v1368_v36 }
 0x1e4   :  { %1241 = vmatpush3.bf16.msra.mxu0 %v1369_v37 }
 0x1e5   :  { %1242 = vmatprep.subr.bf16.mxu0 %v1370_v38 }
 0x1e8   :  { %1243 = vmatpush3.bf16.msra.mxu0 %v1371_v39 }
 0x1e9   :  { %1244 = vmatprep.subr.bf16.mxu0 %v1372_v40 }
 0x1ec   :  { %1245 = vmatpush3.bf16.msra.mxu0 %v1373_v41 }
 0x1ed   :  { %1246 = vmatprep.subr.bf16.mxu0 %v1374_v42 }
 0x1f0   :  { %1247 = vmatpush3.bf16.msra.mxu0 %v1375_v43 }
 0x1f2   :  { %v1226_v51 = vpop.f32.mrf.mxu1 }
 0x1f3   :  { %1035 = vmatmul.mubr.bf16.vlgmr.msra.gmra.mxu0 %v367_v45 }
 0x1f4   :  { %v1227_v52 = vpop.f32.mrf.mxu1 }
 0x1f5   :  { %v1228_v53 = vadd.f32 %v1227_v52, %v1226_v51 }
 0x1f6   :  { %v1229_v54 = vpop.f32.mrf.mxu1 }
 0x1f8   :  { %v1230_v55 = vpop.f32.mrf.mxu1 }
 0x273   :  { %v348_v57 = vpop.f32.mrf.mxu0 }
 0x274   :  { %v349_v58 = vadd.f32 %v1078_v56, %v348_v57 }
 0x275   :  { %v1300_v59 = vpop.f32.mrf.mxu0 }
 0x276   :  { %352 = vst [vmem:[#allocation9] sm:$0xff] %v349_v58 }
 0x277   :  { %1447 = shalt.err (!%p1444_p5)
}
 0x278   :  { %1063 = dma.vmem_to_hbm [thread:$0]  %s1061_s13, 128, %s1607_s9, [#allocation10]  }
 0x279   :  { %s1494_s6 = smov [#allocation8]  }
 0x27a   :  { %s1050_s17 = sshll.u32 %s1494_s6, 4  ;;  %s1051_s17 = int_to_ptr.vmem [resolvable:$true] %s1050_s17 }
 0x27b   :  { %s1456_s18 = scalar_lea.vmem %s1051_s17, 128  ;;  %p1461_p7 = scmp.lt.s32.totalorder %s1051_s17, %s1051_s17 }
 0x27c   :  { %p1457_p6 = scmp.ne.s32.totalorder %s1051_s17, %s1456_s18  ;;  %p1462_p8 = scmp.lt.s32.totalorder %s1456_s18, %s1456_s18 }
 0x27e   :  { %p1463_p9 = por %p1462_p8, %p1461_p7 }
 0x280   :  { %p1464_p10 = pnand %p1463_p9, %p1457_p6 }
 0x293   :  { %v1204_v60 = vpop.f32.mrf.mxu0 }
 0x295   :  { %v1205_v61 = vpop.f32.mrf.mxu0 }
 0x296   :  { %v1206_v62 = vadd.f32 %v1205_v61, %v1204_v60 }
 0x297   :  { %v1207_v63 = vpop.f32.mrf.mxu0 }
 0x298   :  { %v957_v0 = vadd.f32 %v1206_v62, %v1184_v48 }
 0x299   :  { %v1208_v1 = vpop.f32.mrf.mxu0 }
 0x29a   :  { %v997_v2 = vadd.f32 %v1228_v53, %v957_v0 }
 0x2b3   :  { %v1248_v3 = vpop.f32.mrf.mxu0 }
 0x2b5   :  { %v1249_v4 = vpop.f32.mrf.mxu0 }
 0x2b6   :  { %v1250_v5 = vadd.f32 %v1249_v4, %v1248_v3 }
 0x2b7   :  { %v1251_v6 = vpop.f32.mrf.mxu0 }
 0x2b8   :  { %v1037_v7 = vadd.f32 %v1250_v5, %v997_v2 }
 0x2b9   :  { %v1252_v8 = vpop.f32.mrf.mxu0 }
 0x2ba   :  { %1043 = vst [vmem:[#allocation8] sm:$0xff] %v1037_v7 }
 0x2bb   :  { %1467 = shalt.err (!%p1464_p10)
}
 0x2bc   :  { %1053 = dma.vmem_to_hbm [thread:$0]  %s1051_s17, 128, %s1606_s8, [#allocation4]  }
 0x2bd   :  { %1480 = dma.done.wait [#allocation4], 128  }
 0x2be   :  { %1481 = vsyncadd [#allocation4], 4294967168 }
 0x2bf   :  { %1482 = dma.done.wait [#allocation10], 128  }
 0x2c0   :  { %1483 = vsyncadd [#allocation10], 4294967168 }
 0x2c1   :  { %1070 = vsyncpa [#allocation3], 1 }
 0x2c2   :  { %1071 = vsyncpa [#allocation6], 1 }
 0x2c3   :  { %1072 = vsyncpa [#allocation4], 1 }
 0x2c4   :  { %1073 = vsyncpa [#allocation10], 1 }

</bundles_post_ra>
